<compile_context>
chip_gen: v7x
topology: tpu7x:2x2x1
jax: 0.10.0
libtpu: 0.0.40
codegen_flags: <defaults>
</compile_context>

<pallas_src>
import functools

import jax
import jax.numpy as jnp
from jax.experimental import pallas as pl
from jax.experimental.pallas import tpu as pltpu

_LANE = 128      # vreg lane width
_SUBLANE = 8     # f32 sublane count


def _round_up(n, m):
    return ((n + m - 1) // m) * m


def _pad2(a, rows, cols):
    """Zero-pad a 2-D array up to (rows, cols)."""
    return jnp.pad(a, ((0, rows - a.shape[0]), (0, cols - a.shape[1])))


# ----------------------------------------------------------------------------
# Fused kernel: BN -> [GINConv + ReLU] * L -> Linear
# ----------------------------------------------------------------------------
def _fused_gin_kernel(num_gin_layers,
                      x_ref, adj_ref,          # (Np, Dp), (Np, Np)
                      scale_ref, shift_ref,    # (1, Dp) pre-folded BN affine
                      wg_ref, bg_ref,          # (L, Dp, Dp), (L, 1, Dp)
                      ope_ref,                 # SMEM (L,)  = 1 + eps_l
                      wo_ref, bo_ref,          # (Dp, Op), (1, Op)
                      o_ref):                  # (Np, Op)
    # BatchNorm1d (inference): a single FMA; scale/shift folded at trace time.
    # TODO(synk): training-mode batch statistics are not reproduced here.
    h = x_ref[...] * scale_ref[...] + shift_ref[...]
    adj = adj_ref[...]

    # Unrolled GINConv stack, reassociated so A aggregates the already-resident
    # x@W tile instead of re-streaming x:
    #   relu(((1+eps) x + A x) @ W + b) == relu((1+eps)(x@W) + A@(x@W) + b)
    for l in range(num_gin_layers):
        hw = jnp.dot(h, wg_ref[l], preferred_element_type=jnp.float32)
        agg = jnp.dot(adj, hw, preferred_element_type=jnp.float32)
        h = jnp.maximum(ope_ref[l] * hw + agg + bg_ref[l], 0.0)

    # TODO(synk): F.dropout(p=0.5) is identity in eval mode; training-mode
    # stochastic dropout (pltpu.prng_*) is not implemented here.
    o_ref[...] = (
        jnp.dot(h, wo_ref[...], preferred_element_type=jnp.float32) + bo_ref[...]
    )


# ----------------------------------------------------------------------------
# Parameter init (deterministic, mirrors PyTorch module shapes)
# ----------------------------------------------------------------------------
def init_params(key, input_dim, hidden_dim, output_dim, num_layers):
    params = {"gin": []}

    def linear_init(k, din, dout):
        k1, k2 = jax.random.split(k)
        bound = 1.0 / jnp.sqrt(jnp.float32(din))
        w = jax.random.uniform(k1, (din, dout), jnp.float32, -bound, bound)
        b = jax.random.uniform(k2, (dout,), jnp.float32, -bound, bound)
        return w, b

    gin_dims = [(input_dim, hidden_dim)] + [(hidden_dim, hidden_dim)] * (num_layers - 2)
    for din, dout in gin_dims:
        key, sub = jax.random.split(key)
        w, b = linear_init(sub, din, dout)
        # GINConv(train_eps=True) initializes eps to 0.0
        params["gin"].append({"w": w, "b": b, "eps": jnp.float32(0.0)})

    key, sub = jax.random.split(key)
    w, b = linear_init(sub, hidden_dim, output_dim)
    params["out"] = {"w": w, "b": b}

    # BatchNorm1d(input_dim): weight=1, bias=0, running_mean=0, running_var=1
    params["bn"] = {
        "gamma": jnp.ones((input_dim,), jnp.float32),
        "beta": jnp.zeros((input_dim,), jnp.float32),
        "mean": jnp.zeros((input_dim,), jnp.float32),
        "var": jnp.ones((input_dim,), jnp.float32),
    }
    return params


# ----------------------------------------------------------------------------
# Forward pass (mirrors GIN.forward, eval-mode semantics)
# ----------------------------------------------------------------------------
def gin_forward(params, x, edge_index, batch):
    del batch  # unused in the PyTorch forward as well

    N, din = x.shape
    gin_layers = params["gin"]
    num_gin = len(gin_layers)
    hidden = gin_layers[0]["w"].shape[1]
    dout = params["out"]["w"].shape[1]

    # Padded sizes: lane-dense feature dims, sublane-aligned node rows.
    Np = _round_up(N, _SUBLANE)
    Dp = _round_up(max(din, hidden), _LANE)   # shared padded width of GIN stack
    Op = _round_up(dout, _LANE)

    # --- plain-JAX glue (trace time): densify adjacency, fold BN, zero-pad ---
    # Messages flow src -> dst, summed at dst: agg = A @ x with A[dst, src] += 1
    # (duplicate edges accumulate, matching PyG sum aggregation).
    adj = jnp.zeros((N, N), jnp.float32).at[edge_index[1], edge_index[0]].add(1.0)
    adj_p = _pad2(adj, Np, Np)
    x_p = _pad2(x.astype(jnp.float32), Np, Dp)

    bn = params["bn"]
    inv = bn["gamma"] * jax.lax.rsqrt(bn["var"] + 1e-5)
    scale = _pad2(inv.reshape(1, din), 1, Dp)
    shift = _pad2((bn["beta"] - bn["mean"] * inv).reshape(1, din), 1, Dp)

    wg = jnp.stack([_pad2(l["w"], Dp, Dp) for l in gin_layers])                # (L,Dp,Dp)
    bg = jnp.stack([_pad2(l["b"].reshape(1, -1), 1, Dp) for l in gin_layers])  # (L,1,Dp)
    one_plus_eps = jnp.stack(
        [1.0 + l["eps"].astype(jnp.float32) for l in gin_layers])              # (L,)

    wo = _pad2(params["out"]["w"], Dp, Op)
    bo = _pad2(params["out"]["b"].reshape(1, -1), 1, Op)

    vmem = pl.BlockSpec(memory_space=pltpu.MemorySpace.VMEM)
    smem = pl.BlockSpec(memory_space=pltpu.MemorySpace.SMEM)

    out_p = pl.pallas_call(
        functools.partial(_fused_gin_kernel, num_gin),
        out_shape=jax.ShapeDtypeStruct((Np, Op), jnp.float32),
        in_specs=[vmem, vmem,        # x, adj
                  vmem, vmem,        # BN scale, shift
                  vmem, vmem,        # GIN weights, biases
                  smem,              # (1+eps) scalars
                  vmem, vmem],       # output-layer weight, bias
        out_specs=vmem,
    )(x_p, adj_p, scale, shift, wg, bg, one_plus_eps, wo, bo)

    return out_p[:N, :dout]


if __name__ == "__main__":
    key = jax.random.PRNGKey(0)

    N, E = 16, 32
    input_dim, hidden_dim, output_dim, num_layers = 8, 32, 8, 3

    key, kx, ke = jax.random.split(key, 3)
    x = jax.random.normal(kx, (N, input_dim), jnp.float32)
    edge_index = jax.random.randint(ke, (2, E), 0, N, dtype=jnp.int32)
    batch = jnp.zeros((N,), jnp.int32)

    params = init_params(jax.random.PRNGKey(1), input_dim, hidden_dim,
                         output_dim, num_layers)

    fwd = jax.jit(functools.partial(gin_forward, params))
    out = fwd(x, edge_index, batch)
    jax.block_until_ready(out)
    assert out.shape == (N, output_dim), out.shape
    assert out.dtype == jnp.float32
    print("KERNEL_OK")
</pallas_src>

<mosaic_0001>
module attributes {stable_mosaic.version = 11 : i64} {
  func.func private @main(%arg0: i32) attributes {dimension_semantics = [#tpu.dimension_semantics<core_parallel>], iteration_bounds = array<i64: 2>, tpu.core_type = #tpu.core_type<sc_scalar_subcore>, window_params = []} {
    return
  }
}

module attributes {stable_mosaic.version = 11 : i64} {
  func.func private @main(%arg0: i32) attributes {dimension_semantics = [#tpu.dimension_semantics<core_parallel>], iteration_bounds = array<i64: 2>, tpu.core_type = #tpu.core_type<sc_scalar_subcore>, window_params = []} {
    return
  }
}

module attributes {stable_mosaic.version = 11 : i64} {
  func.func @_fused_gin_kernel(%arg0: memref<16x128xf32, #tpu.memory_space<vmem>>, %arg1: memref<16x16xf32, #tpu.memory_space<vmem>>, %arg2: memref<1x128xf32, #tpu.memory_space<vmem>>, %arg3: memref<1x128xf32, #tpu.memory_space<vmem>>, %arg4: memref<2x128x128xf32, #tpu.memory_space<vmem>>, %arg5: memref<2x1x128xf32, #tpu.memory_space<vmem>>, %arg6: memref<2xf32, #tpu.memory_space<smem>>, %arg7: memref<128x128xf32, #tpu.memory_space<vmem>>, %arg8: memref<1x128xf32, #tpu.memory_space<vmem>>, %arg9: memref<16x128xf32, #tpu.memory_space<vmem>>) attributes {dimension_semantics = [], scalar_prefetch = 0 : i64, scratch_operands = 0 : i64, tpu.core_type = #tpu.core_type<tc>} {
    %c0 = arith.constant 0 : index
    %c0_0 = arith.constant 0 : index
    %0 = vector.load %arg0[%c0, %c0_0] : memref<16x128xf32, #tpu.memory_space<vmem>>, vector<16x128xf32>
    %c0_1 = arith.constant 0 : index
    %c0_2 = arith.constant 0 : index
    %1 = vector.load %arg2[%c0_1, %c0_2] : memref<1x128xf32, #tpu.memory_space<vmem>>, vector<1x128xf32>
    %2 = vector.broadcast %1 : vector<1x128xf32> to vector<16x128xf32>
    %3 = arith.mulf %0, %2 : vector<16x128xf32>
    %c0_3 = arith.constant 0 : index
    %c0_4 = arith.constant 0 : index
    %4 = vector.load %arg3[%c0_3, %c0_4] : memref<1x128xf32, #tpu.memory_space<vmem>>, vector<1x128xf32>
    %5 = vector.broadcast %4 : vector<1x128xf32> to vector<16x128xf32>
    %6 = arith.addf %3, %5 : vector<16x128xf32>
    %c0_5 = arith.constant 0 : index
    %c0_6 = arith.constant 0 : index
    %7 = vector.load %arg1[%c0_5, %c0_6] : memref<16x16xf32, #tpu.memory_space<vmem>>, vector<16x16xf32>
    %c0_7 = arith.constant 0 : index
    %c0_8 = arith.constant 0 : index
    %c0_9 = arith.constant 0 : index
    %8 = vector.load %arg4[%c0_7, %c0_8, %c0_9] : memref<2x128x128xf32, #tpu.memory_space<vmem>>, vector<1x128x128xf32>
    %9 = vector.shape_cast %8 : vector<1x128x128xf32> to vector<128x128xf32>
    %cst = arith.constant dense<0.000000e+00> : vector<16x128xf32>
    %10 = tpu.matmul %6, %9, %cst {dimension_numbers = #tpu.dot_dimension_numbers<[1], [0], [0], [1], [0, 0, 1, 1], [], []>} : vector<16x128xf32>, vector<128x128xf32>, vector<16x128xf32> -> vector<16x128xf32>
    %cst_10 = arith.constant dense<0.000000e+00> : vector<16x128xf32>
    %11 = tpu.matmul %7, %10, %cst_10 {dimension_numbers = #tpu.dot_dimension_numbers<[1], [0], [0], [1], [0, 0, 1, 1], [], []>} : vector<16x16xf32>, vector<16x128xf32>, vector<16x128xf32> -> vector<16x128xf32>
    %c0_11 = arith.constant 0 : index
    %12 = memref.load %arg6[%c0_11] : memref<2xf32, #tpu.memory_space<smem>>
    %13 = vector.broadcast %12 : f32 to vector<16x128xf32>
    %14 = arith.mulf %13, %10 : vector<16x128xf32>
    %15 = arith.addf %14, %11 : vector<16x128xf32>
    %c0_12 = arith.constant 0 : index
    %c0_13 = arith.constant 0 : index
    %c0_14 = arith.constant 0 : index
    %16 = vector.load %arg5[%c0_12, %c0_13, %c0_14] : memref<2x1x128xf32, #tpu.memory_space<vmem>>, vector<1x1x128xf32>
    %17 = vector.shape_cast %16 : vector<1x1x128xf32> to vector<1x128xf32>
    %18 = vector.broadcast %17 : vector<1x128xf32> to vector<16x128xf32>
    %19 = arith.addf %15, %18 : vector<16x128xf32>
    %cst_15 = arith.constant 0.000000e+00 : f32
    %20 = vector.broadcast %cst_15 : f32 to vector<16x128xf32>
    %21 = arith.maximumf %19, %20 : vector<16x128xf32>
    %c1 = arith.constant 1 : index
    %c0_16 = arith.constant 0 : index
    %c0_17 = arith.constant 0 : index
    %22 = vector.load %arg4[%c1, %c0_16, %c0_17] : memref<2x128x128xf32, #tpu.memory_space<vmem>>, vector<1x128x128xf32>
    %23 = vector.shape_cast %22 : vector<1x128x128xf32> to vector<128x128xf32>
    %cst_18 = arith.constant dense<0.000000e+00> : vector<16x128xf32>
    %24 = tpu.matmul %21, %23, %cst_18 {dimension_numbers = #tpu.dot_dimension_numbers<[1], [0], [0], [1], [0, 0, 1, 1], [], []>} : vector<16x128xf32>, vector<128x128xf32>, vector<16x128xf32> -> vector<16x128xf32>
    %cst_19 = arith.constant dense<0.000000e+00> : vector<16x128xf32>
    %25 = tpu.matmul %7, %24, %cst_19 {dimension_numbers = #tpu.dot_dimension_numbers<[1], [0], [0], [1], [0, 0, 1, 1], [], []>} : vector<16x16xf32>, vector<16x128xf32>, vector<16x128xf32> -> vector<16x128xf32>
    %c1_20 = arith.constant 1 : index
    %26 = memref.load %arg6[%c1_20] : memref<2xf32, #tpu.memory_space<smem>>
    %27 = vector.broadcast %26 : f32 to vector<16x128xf32>
    %28 = arith.mulf %27, %24 : vector<16x128xf32>
    %29 = arith.addf %28, %25 : vector<16x128xf32>
    %c1_21 = arith.constant 1 : index
    %c0_22 = arith.constant 0 : index
    %c0_23 = arith.constant 0 : index
    %30 = vector.load %arg5[%c1_21, %c0_22, %c0_23] : memref<2x1x128xf32, #tpu.memory_space<vmem>>, vector<1x1x128xf32>
    %31 = vector.shape_cast %30 : vector<1x1x128xf32> to vector<1x128xf32>
    %32 = vector.broadcast %31 : vector<1x128xf32> to vector<16x128xf32>
    %33 = arith.addf %29, %32 : vector<16x128xf32>
    %cst_24 = arith.constant 0.000000e+00 : f32
    %34 = vector.broadcast %cst_24 : f32 to vector<16x128xf32>
    %35 = arith.maximumf %33, %34 : vector<16x128xf32>
    %c0_25 = arith.constant 0 : index
    %c0_26 = arith.constant 0 : index
    %36 = vector.load %arg7[%c0_25, %c0_26] : memref<128x128xf32, #tpu.memory_space<vmem>>, vector<128x128xf32>
    %cst_27 = arith.constant dense<0.000000e+00> : vector<16x128xf32>
    %37 = tpu.matmul %35, %36, %cst_27 {dimension_numbers = #tpu.dot_dimension_numbers<[1], [0], [0], [1], [0, 0, 1, 1], [], []>} : vector<16x128xf32>, vector<128x128xf32>, vector<16x128xf32> -> vector<16x128xf32>
    %c0_28 = arith.constant 0 : index
    %c0_29 = arith.constant 0 : index
    %38 = vector.load %arg8[%c0_28, %c0_29] : memref<1x128xf32, #tpu.memory_space<vmem>>, vector<1x128xf32>
    %39 = vector.broadcast %38 : vector<1x128xf32> to vector<16x128xf32>
    %40 = arith.addf %37, %39 : vector<16x128xf32>
    %c0_30 = arith.constant 0 : index
    %c0_31 = arith.constant 0 : index
    %41 = vector.load %arg9[%c0_30, %c0_31] : memref<16x128xf32, #tpu.memory_space<vmem>>, vector<16x128xf32>
    tpu.vector_store %arg9[%c0_30, %c0_31], %40 {strides = array<i32>} : memref<16x128xf32, #tpu.memory_space<vmem>>, vector<16x128xf32>,
    return
  }
}

</mosaic_0001>

<bundles_post_ra>
// kernel: gin_forward.1
= control target key start
LH: loop header
LB: loop body
LE: loop exit
PB: predicated region body
PF: predicated region fallthrough
CT: control target
= control target key end

     0   :  { %14 = vsyncpa [#allocation3], 0  ;;  %s1168_s0 = inlined_call_operand.vmem [shape: f32[16,128], index: 0, kind: input, shape index: {}]   ;;  %s1169_s1 = inlined_call_operand.hbm [shape: f32[16,16], index: 1, kind: input, shape index: {}]   ;;  %s1170_s2 = inlined_call_operand.vmem [shape: f32[1,128], index: 2, kind: input, shape index: {}]   ;;  %s1171_s3 = inlined_call_operand.vmem [shape: f32[1,128], index: 3, kind: input, shape index: {}]   ;;  %s1172_s4 = inlined_call_operand.vmem [shape: f32[2,128,128], index: 4, kind: input, shape index: {}]   ;;  %s1173_s5 = inlined_call_operand.vmem [shape: f32[2,1,128], index: 5, kind: input, shape index: {}]   ;;  %s1174_s6 = inlined_call_operand.vmem [shape: f32[2], index: 6, kind: input, shape index: {}]   ;;  %s1175_s7 = inlined_call_operand.vmem [shape: f32[128,128], index: 7, kind: input, shape index: {}]   ;;  %s1176_s8 = inlined_call_operand.vmem [shape: f32[1,128], index: 8, kind: input, shape index: {}]   ;;  %s1177_s9 = inlined_call_operand.vmem [shape: f32[16,128], index: 9, kind: output, shape index: {}]  }
   0x1   :  { %15 = vsyncpa [#allocation4], 0  ;;  %s916_s30 = smov [#allocation2]   ;;  %s44_s13 = sshll.u32 %s1174_s6, 4  ;;  %s45_s13 = int_to_ptr.vmem [resolvable:$true] %s44_s13 }
   0x2   :  { %s23_s10 = sshll.u32 %s916_s30, 4  ;;  %s878_s16 = scalar_lea.hbm %s1169_s1, 256  ;;  %s24_s10 = int_to_ptr.vmem [resolvable:$true] %s23_s10 }
   0x3   :  { %p879_p0 = scmp.ne.s32.totalorder %s1169_s1, %s878_s16  ;;  %p882_p1 = scmp.lt.u32.totalorder %s878_s16, %s1169_s1 }
   0x5   :  { %p884_p2 = pnand %p882_p1, %p879_p0 }
   0x7   :  { %887 = shalt.err (!%p884_p2)
}
   0x8   :  { %s888_s21 = scalar_lea.vmem %s24_s10, 256  ;;  %p893_p4 = scmp.lt.s32.totalorder %s24_s10, %s24_s10 }
   0x9   :  { %p889_p3 = scmp.ne.s32.totalorder %s24_s10, %s888_s21  ;;  %p894_p5 = scmp.lt.s32.totalorder %s888_s21, %s888_s21 }
   0xb   :  { %p895_p6 = por %p894_p5, %p893_p4 }
   0xd   :  { %p896_p7 = pnand %p895_p6, %p889_p3 }
   0xf   :  { %899 = shalt.err (!%p896_p7)
}
  0x10   :  { %s917_s6 = smov 128   ;;  %s918_s22 = smov 8  }
  0x11   :  { %29 = dma.hbm_to_vmem [thread:$0]  %s1169_s1, 256, %s24_s10, [#allocation3], %s917_s6, %s917_s6, %s918_s22  }
  0x12   :  { %s900_s25 = scalar_lea.vmem %s45_s13, 16  ;;  %p905_p9 = scmp.lt.s32.totalorder %s45_s13, %s45_s13 }
  0x13   :  { %p901_p8 = scmp.ne.s32.totalorder %s45_s13, %s900_s25  ;;  %p906_p10 = scmp.lt.s32.totalorder %s900_s25, %s900_s25 }
  0x15   :  { %p907_p11 = por %p906_p10, %p905_p9 }
  0x17   :  { %p908_p12 = pnand %p907_p11, %p901_p8 }
  0x19   :  { %911 = shalt.err (!%p908_p12)
}
  0x1a   :  { %s919_s26 = smov [#allocation5]  }
  0x1b   :  { %47 = dma.vmem_to_smem %s45_s13, 16, %s919_s26, [#allocation4]  }
  0x1c   :  { %912 = dma.done.wait [#allocation3], 256  }
  0x1d   :  { %913 = vsyncadd [#allocation3], 4294967040 }
  0x1e   :  { %914 = dma.done.wait [#allocation4], 16  }
  0x1f   :  { %915 = vsyncadd [#allocation4], 4294967280 }
  0x20   :  { %58 = sfence }
  0x21   :  { %v81_v0 = vld [vmem:[%s1172_s4] sm:$0xff]  ;;  %v82_v1 = vld [vmem:[%s1172_s4 + $0x8] sm:$0xff]  ;;  %v83_v2 = vld [vmem:[%s1172_s4 + $0x10] sm:$0xff]  ;;  %vm172_vm0 = vcmask 130048   ;;  %s254_s24 = sld [smem:[#allocation5]]  ;;  %s585_s29 = sld [smem:[#allocation5 + $0x1]] }
  0x22   :  { %v770_v3 = vpack.c.bf16 %v82_v1, %v81_v0  ;;  %v84_v4 = vld [vmem:[%s1172_s4 + $0x18] sm:$0xff]  ;;  %v85_v6 = vld [vmem:[%s1172_s4 + $0x20] sm:$0xff]  ;;  %v86_v7 = vld [vmem:[%s1172_s4 + $0x28] sm:$0xff] }
  0x23   :  { %v774_v5 = vpack.c.bf16 %v84_v4, %v83_v2  ;;  %v778_v8 = vpack.c.bf16 %v86_v7, %v85_v6  ;;  %v87_v9 = vld [vmem:[%s1172_s4 + $0x30] sm:$0xff]  ;;  %v59_v10 = vld [vmem:[%s1168_s0] sm:$0xff]  ;;  %v88_v11 = vld [vmem:[%s1172_s4 + $0x38] sm:$0xff] }
  0x24   :  { %771 = vmatprep.subr.bf16.mxu0 %v770_v3  ;;  %v562_v12 = vld [vmem:[%s1170_s2] ss:$0 sm:$0xff]  ;;  %v782_v15 = vpack.c.bf16 %v88_v11, %v87_v9  ;;  %v90_v18 = vld [vmem:[%s1172_s4 + $0x48] sm:$0xff]  ;;  %v91_v20 = vld [vmem:[%s1172_s4 + $0x50] sm:$0xff] }
  0x25   :  { %773 = vmatpush3.bf16.msra.mxu0 %v770_v3  ;;  %v563_v13 = vld [vmem:[%s1171_s3] ss:$0 sm:$0xff]  ;;  %v68_v14 = vmul.f32 %v562_v12, %v59_v10  ;;  %v92_v21 = vld [vmem:[%s1172_s4 + $0x58] sm:$0xff]  ;;  %v94_v24 = vld [vmem:[%s1172_s4 + $0x68] sm:$0xff] }
  0x26   :  { %775 = vmatprep.subr.bf16.mxu0 %v774_v5  ;;  %v89_v17 = vld [vmem:[%s1172_s4 + $0x40] sm:$0xff]  ;;  %v790_v22 = vpack.c.bf16 %v92_v21, %v91_v20  ;;  %v95_v26 = vld [vmem:[%s1172_s4 + $0x70] sm:$0xff]  ;;  %v96_v27 = vld [vmem:[%s1172_s4 + $0x78] sm:$0xff] }
  0x27   :  { %v77_v16 = vadd.f32 %v563_v13, %v68_v14  ;;  %v786_v19 = vpack.c.bf16 %v90_v18, %v89_v17  ;;  %v93_v23 = vld [vmem:[%s1172_s4 + $0x60] sm:$0xff]  ;;  %v60_v28 = vld [vmem:[%s1168_s0 + $0x8] sm:$0xff]  ;;  %v798_v29 = vpack.c.bf16 %v96_v27, %v95_v26  ;;  %v569_v39 = vld [vmem:[%s1172_s4 + $0x90] sm:$0xff]  ;;  %v255_v61 = vstv %s254_s24 }
  0x28   :  { %v794_v25 = vpack.c.bf16 %v94_v24, %v93_v23  ;;  %v69_v30 = vmul.f32 %v562_v12, %v60_v28  ;;  %v1045_v32 = vld [vmem:[#allocation2] sm:$0xff]  ;;  %v568_v34 = vld [vmem:[%s1172_s4 + $0x88] sm:$0xff]  ;;  %v570_v40 = vld [vmem:[%s1172_s4 + $0x98] sm:$0xff] }
  0x29   :  { %777 = vmatpush3.bf16.msra.mxu0 %v774_v5  ;;  %683 = vmatprep.mubr.f32.mxu0 %v77_v16  ;;  %v567_v33 = vld [vmem:[%s1172_s4 + $0x80] sm:$0xff]  ;;  %v1061_v41 = vld [vmem:[#allocation2 + $0x8] sm:$0xff]  ;;  %v810_v42 = vpack.c.bf16 %v570_v40, %v569_v39  ;;  %v573_v46 = vld [vmem:[%s1172_s4 + $0xb0] sm:$0xff] }
  0x2a   :  { %779 = vmatprep.subr.bf16.mxu0 %v778_v8  ;;  %v78_v31 = vadd.f32 %v563_v13, %v69_v30  ;;  %690 = vmatprep.mubr.msk.f32.mxu1 %vm172_vm0, %v1045_v32  ;;  %v806_v38 = vpack.c.bf16 %v568_v34, %v567_v33  ;;  %v571_v43 = vld [vmem:[%s1172_s4 + $0xa0] sm:$0xff]  ;;  %v572_v44 = vld [vmem:[%s1172_s4 + $0xa8] sm:$0xff]  ;;  %v574_v47 = vld [vmem:[%s1172_s4 + $0xb8] sm:$0xff] }
  0x2b   :  { %v814_v45 = vpack.c.bf16 %v572_v44, %v571_v43  ;;  %v818_v48 = vpack.c.bf16 %v574_v47, %v573_v46  ;;  %v575_v49 = vld [vmem:[%s1172_s4 + $0xc0] sm:$0xff]  ;;  %v576_v50 = vld [vmem:[%s1172_s4 + $0xc8] sm:$0xff]  ;;  %v577_v52 = vld [vmem:[%s1172_s4 + $0xd0] sm:$0xff] }
  0x2c   :  { %v822_v51 = vpack.c.bf16 %v576_v50, %v575_v49  ;;  %v578_v53 = vld [vmem:[%s1172_s4 + $0xd8] sm:$0xff]  ;;  %v579_v55 = vld [vmem:[%s1172_s4 + $0xe0] sm:$0xff]  ;;  %v580_v56 = vld [vmem:[%s1172_s4 + $0xe8] sm:$0xff] }
  0x2d   :  { %781 = vmatpush3.bf16.msra.mxu0 %v778_v8  ;;  %v826_v54 = vpack.c.bf16 %v578_v53, %v577_v52  ;;  %v830_v57 = vpack.c.bf16 %v580_v56, %v579_v55  ;;  %v581_v58 = vld [vmem:[%s1172_s4 + $0xf0] sm:$0xff]  ;;  %v582_v59 = vld [vmem:[%s1172_s4 + $0xf8] sm:$0xff]  ;;  %v566_v1 = vld [vmem:[%s1173_s5] ss:$0 sm:$0xff] }
  0x2e   :  { %783 = vmatprep.subr.bf16.mxu0 %v782_v15  ;;  %v834_v60 = vpack.c.bf16 %v582_v59, %v581_v58  ;;  %v456_v9 = vld [vmem:[%s1175_s7] sm:$0xff]  ;;  %v457_v10 = vld [vmem:[%s1175_s7 + $0x8] sm:$0xff]  ;;  %v458_v11 = vld [vmem:[%s1175_s7 + $0x10] sm:$0xff] }
  0x2f   :  { %v842_v12 = vpack.c.bf16 %v457_v10, %v456_v9  ;;  %v459_v13 = vld [vmem:[%s1175_s7 + $0x18] sm:$0xff]  ;;  %v461_v16 = vld [vmem:[%s1175_s7 + $0x28] sm:$0xff]  ;;  %v462_v18 = vld [vmem:[%s1175_s7 + $0x30] sm:$0xff] }
  0x30   :  { %v846_v14 = vpack.c.bf16 %v459_v13, %v458_v11  ;;  %v464_v21 = vld [vmem:[%s1175_s7 + $0x40] sm:$0xff]  ;;  %v466_v24 = vld [vmem:[%s1175_s7 + $0x50] sm:$0xff]  ;;  %v471_v34 = vld [vmem:[%s1175_s7 + $0x78] sm:$0xff] }
  0x31   :  { %785 = vmatpush3.bf16.msra.mxu0 %v782_v15  ;;  %v460_v15 = vld [vmem:[%s1175_s7 + $0x20] sm:$0xff]  ;;  %v470_v33 = vld [vmem:[%s1175_s7 + $0x70] sm:$0xff] }
  0x32   :  { %787 = vmatprep.subr.bf16.mxu0 %v786_v19  ;;  %v850_v17 = vpack.c.bf16 %v461_v16, %v460_v15  ;;  %v468_v30 = vld [vmem:[%s1175_s7 + $0x60] sm:$0xff] }
  0x33   :  { %v587_v40 = vld [vmem:[%s1173_s5 + $0x1] ss:$0 sm:$0xff] }
  0x35   :  { %789 = vmatpush3.bf16.msra.mxu0 %v786_v19  ;;  %v463_v19 = vld [vmem:[%s1175_s7 + $0x38] sm:$0xff] }
  0x36   :  { %791 = vmatprep.subr.bf16.mxu0 %v790_v22  ;;  %v854_v20 = vpack.c.bf16 %v463_v19, %v462_v18 }
  0x39   :  { %793 = vmatpush3.bf16.msra.mxu0 %v790_v22  ;;  %v465_v22 = vld [vmem:[%s1175_s7 + $0x48] sm:$0xff] }
  0x3a   :  { %795 = vmatprep.subr.bf16.mxu0 %v794_v25  ;;  %v858_v23 = vpack.c.bf16 %v465_v22, %v464_v21 }
  0x3d   :  { %797 = vmatpush3.bf16.msra.mxu0 %v794_v25  ;;  %v467_v25 = vld [vmem:[%s1175_s7 + $0x58] sm:$0xff] }
  0x3e   :  { %799 = vmatprep.subr.bf16.mxu0 %v798_v29  ;;  %v862_v26 = vpack.c.bf16 %v467_v25, %v466_v24 }
  0x41   :  { %801 = vmatpush3.bf16.msra.mxu0 %v798_v29 }
  0x42   :  { %843 = vmatprep.subr.bf16.mxu0 %v842_v12 }
  0x44   :  { %684 = vmatmul.mubr.f32.vlgmr.msra.gmra.mrb[0].mxu0 %v78_v31  ;;  %v469_v31 = vld [vmem:[%s1175_s7 + $0x68] sm:$0xff] }
  0x45   :  { %845 = vmatpush3.bf16.msra.mxu0 %v842_v12 }
  0x46   :  { %847 = vmatprep.subr.bf16.mxu0 %v846_v14 }
  0x49   :  { %849 = vmatpush3.bf16.msra.mxu0 %v846_v14 }
  0x4a   :  { %851 = vmatprep.subr.bf16.mxu0 %v850_v17 }
  0x4d   :  { %853 = vmatpush3.bf16.msra.mxu0 %v850_v17 }
  0x4e   :  { %855 = vmatprep.subr.bf16.mxu0 %v854_v20 }
  0x51   :  { %857 = vmatpush3.bf16.msra.mxu0 %v854_v20 }
  0x52   :  { %859 = vmatprep.subr.bf16.mxu0 %v858_v23 }
  0x55   :  { %861 = vmatpush3.bf16.msra.mxu0 %v858_v23 }
  0x56   :  { %863 = vmatprep.subr.bf16.mxu0 %v862_v26 }
  0x59   :  { %865 = vmatpush3.bf16.msra.mxu0 %v862_v26 }
 0x117   :  { %v685_v35 = vpop.f32.mrb[0].mxu0 }
 0x118   :  { %v163_v36 = vpop.f32.mrb[1].mxu0  ;;  %v257_v62 = vmul.f32 %v685_v35, %v255_v61 }
 0x119   :  { %v802_v37 = vpack.c.bf16 %v685_v35, %v163_v36  ;;  %v256_v63 = vmul.f32 %v255_v61, %v163_v36  ;;  %v870_v35 = vpack.c.bf16 %v471_v34, %v470_v33  ;;  %v439_v36 = vstv %s585_s29 }
 0x11b   :  { %803 = vmatprep.subr.bf16.mxu1 %v802_v37 }
 0x11c   :  { %805 = vmatpush3.bf16.msra.mxu1 %v802_v37 }
 0x11d   :  { %807 = vmatprep.subr.bf16.mxu1 %v806_v38 }
 0x11f   :  { %691 = vmatmul.mubr.msk.f32.vlgmr.msra.gmra.mrb[0].mxu1 %vm172_vm0, %v1061_v41 }
 0x120   :  { %809 = vmatpush3.bf16.msra.mxu1 %v806_v38 }
 0x121   :  { %811 = vmatprep.subr.bf16.mxu1 %v810_v42 }
 0x124   :  { %813 = vmatpush3.bf16.msra.mxu1 %v810_v42 }
 0x125   :  { %815 = vmatprep.subr.bf16.mxu1 %v814_v45 }
 0x128   :  { %817 = vmatpush3.bf16.msra.mxu1 %v814_v45 }
 0x129   :  { %819 = vmatprep.subr.bf16.mxu1 %v818_v48 }
 0x12c   :  { %821 = vmatpush3.bf16.msra.mxu1 %v818_v48  ;;  %v588_v48 = vld [vmem:[%s1176_s8] ss:$0 sm:$0xff] }
 0x12d   :  { %823 = vmatprep.subr.bf16.mxu1 %v822_v51 }
 0x130   :  { %825 = vmatpush3.bf16.msra.mxu1 %v822_v51 }
 0x131   :  { %827 = vmatprep.subr.bf16.mxu1 %v826_v54 }
 0x134   :  { %829 = vmatpush3.bf16.msra.mxu1 %v826_v54 }
 0x135   :  { %831 = vmatprep.subr.bf16.mxu1 %v830_v57 }
 0x138   :  { %833 = vmatpush3.bf16.msra.mxu1 %v830_v57 }
 0x139   :  { %835 = vmatprep.subr.bf16.mxu1 %v834_v60 }
 0x13c   :  { %837 = vmatpush3.bf16.msra.mxu1 %v834_v60 }
 0x1f2   :  { %v692_v0 = vpop.f32.mrb[0].mxu1 }
 0x1f3   :  { %v259_v2 = vadd.f32 %v692_v0, %v257_v62  ;;  %v245_v3 = vpop.f32.mrb[1].mxu1 }
 0x1f4   :  { %v258_v4 = vadd.f32 %v256_v63, %v245_v3 }
 0x1f5   :  { %v268_v5 = vadd.f32 %v566_v1, %v259_v2 }
 0x1f6   :  { %v267_v6 = vadd.f32 %v566_v1, %v258_v4 }
 0x1f7   :  { %v270_v8 = vmax.f32 %v268_v5, 0.0 }
 0x1f8   :  { %v269_v7 = vmax.f32 %v267_v6, 0.0 }
 0x1fa   :  { %725 = vmatprep.mubr.f32.mxu1 %v269_v7 }
 0x1fb   :  { %726 = vmatmul.mubr.f32.vlgmr.msra.gmra.mrb[2].mxu1 %v270_v8 }
 0x1fc   :  { %732 = vmatprep.mubr.msk.f32.mxu1 %vm172_vm0, %v1045_v32  ;;  %v866_v32 = vpack.c.bf16 %v469_v31, %v468_v30 }
 0x1fe   :  { %867 = vmatprep.subr.bf16.mxu0 %v866_v32 }
 0x1ff   :  { %869 = vmatpush3.bf16.msra.mxu0 %v866_v32 }
 0x200   :  { %871 = vmatprep.subr.bf16.mxu0 %v870_v35 }
 0x203   :  { %873 = vmatpush3.bf16.msra.mxu0 %v870_v35 }
 0x2ce   :  { %v727_v27 = vpop.f32.mrb[2].mxu1 }
 0x2cf   :  { %v354_v28 = vpop.f32.mrb[3].mxu1  ;;  %v441_v37 = vmul.f32 %v727_v27, %v439_v36 }
 0x2d0   :  { %v838_v29 = vpack.c.bf16 %v727_v27, %v354_v28  ;;  %v440_v38 = vmul.f32 %v439_v36, %v354_v28 }
 0x2d2   :  { %839 = vmatprep.subr.bf16.mxu1 %v838_v29 }
 0x2d3   :  { %841 = vmatpush3.bf16.msra.mxu1 %v838_v29 }
 0x2d6   :  { %733 = vmatmul.mubr.msk.f32.vlgmr.msra.gmra.mrb[4].mxu1 %vm172_vm0, %v1061_v41 }
 0x3a9   :  { %v734_v39 = vpop.f32.mrb[4].mxu1 }
 0x3aa   :  { %v443_v41 = vadd.f32 %v734_v39, %v441_v37  ;;  %v429_v42 = vpop.f32.mrb[5].mxu1 }
 0x3ab   :  { %v442_v43 = vadd.f32 %v440_v38, %v429_v42 }
 0x3ac   :  { %v453_v44 = vadd.f32 %v587_v40, %v443_v41 }
 0x3ad   :  { %v452_v45 = vadd.f32 %v587_v40, %v442_v43 }
 0x3ae   :  { %v455_v47 = vmax.f32 %v453_v44, 0.0 }
 0x3af   :  { %v454_v46 = vmax.f32 %v452_v45, 0.0 }
 0x3b1   :  { %767 = vmatprep.mubr.f32.mxu0 %v454_v46 }
 0x3b2   :  { %768 = vmatmul.mubr.f32.vlgmr.msra.gmra.mrb[2].mxu0 %v455_v47 }
 0x485   :  { %v769_v49 = vpop.f32.mrb[2].mxu0 }
 0x486   :  { %v551_v50 = vadd.f32 %v769_v49, %v588_v48  ;;  %v545_v51 = vpop.f32.mrb[3].mxu0 }
 0x487   :  { %v546_v52 = vadd.f32 %v588_v48, %v545_v51 }
 0x488   :  { %555 = vst [vmem:[%s1177_s9 + $0x8] sm:$0xff] %v551_v50 }
 0x489   :  { %554 = vst [vmem:[%s1177_s9] sm:$0xff] %v546_v52 }
 0x48a   :  { %560 = vsyncpa [#allocation3], 1 }
 0x48b   :  { %561 = vsyncpa [#allocation4], 1 }

</bundles_post_ra>
